<compile_context>
chip_gen: v5e
topology: v5e:2x2
jax: 0.10.0
libtpu: 0.0.40
codegen_flags: <defaults>
</compile_context>

<pallas_src>
import functools

import numpy as np
import jax
import jax.numpy as jnp
from jax import lax
from jax.experimental import pallas as pl
from jax.experimental.pallas import tpu as pltpu


# ----------------------------------- kernel body -----------------------------------
def _affd_compute(x, mask_ref, w1_ref, t1_ref, wb1_ref, tb1_ref,
                  wb2_ref, tb2_ref, w2_ref, t2_ref, out_ref, *, H, W, c):
    """x: (cin, HW) f32.  c is the (sublane-padded) hidden width."""
    HW = H * W
    masks = mask_ref[...]                                  # (8, HW) f32, grid-invariant

    # ---- cv1: both channel halves fused into one 1x1 matmul (BN scale pre-folded)
    y1 = jnp.dot(w1_ref[...], x.astype(jnp.bfloat16),
                 preferred_element_type=jnp.float32)       # (2c, HW) f32
    y1 = jnp.maximum(y1 + t1_ref[...], 0.0)
    a = y1[:c]                                             # sublane-aligned row halves
    b = y1[c:]

    def im2col3x3(v):
        # (c, HW) f32 -> (9c, HW) bf16: lane-rolled, boundary-masked taps (zero padding).
        taps = []
        for t in range(9):
            dy, dx = t // 3 - 1, t % 3 - 1
            if dy == 0 and dx == 0:
                taps.append(v)
            else:
                mi = t if t < 4 else t - 1                 # mask row for this tap
                shift = (-(dy * W + dx)) % HW
                taps.append(pltpu.roll(v, shift, 1) * masks[mi:mi + 1])
        return jnp.concatenate(taps, axis=0).astype(jnp.bfloat16)

    # ---- bottleneck (n=1, residual): m = a + ConvBNReLU3x3(ConvBNReLU3x3(a))
    h1 = jnp.maximum(
        jnp.dot(wb1_ref[...], im2col3x3(a), preferred_element_type=jnp.float32)
        + tb1_ref[...], 0.0)
    h2 = jnp.maximum(
        jnp.dot(wb2_ref[...], im2col3x3(h1), preferred_element_type=jnp.float32)
        + tb2_ref[...], 0.0)
    m = a + h2                                             # residual in f32

    # ---- cv2: single 1x1 matmul over the sublane-stacked [m; b] (c % 8 == 0 -> aligned)
    mb = jnp.concatenate([m, b], axis=0).astype(jnp.bfloat16)
    y = jnp.dot(w2_ref[...], mb, preferred_element_type=jnp.float32)
    out_ref[0] = jnp.maximum(y + t2_ref[...], 0.0)


def _affd_kernel_fused(nw_ref, x1_ref, x2_ref, mask_ref, w1_ref, t1_ref, wb1_ref,
                       tb1_ref, wb2_ref, tb2_ref, w2_ref, t2_ref, out_ref, *, H, W, c):
    # softmax-weighted input fusion: x = nw0*x1 + nw1*x2   (f32, VPU)
    x = nw_ref[0] * x1_ref[0] + nw_ref[1] * x2_ref[0]
    _affd_compute(x, mask_ref, w1_ref, t1_ref, wb1_ref, tb1_ref,
                  wb2_ref, tb2_ref, w2_ref, t2_ref, out_ref, H=H, W=W, c=c)


def _affd_kernel_single(x1_ref, mask_ref, w1_ref, t1_ref, wb1_ref, tb1_ref,
                        wb2_ref, tb2_ref, w2_ref, t2_ref, out_ref, *, H, W, c):
    # forward(x1) path of the module: x = x1 exactly (no fusion, no second input DMA)
    _affd_compute(x1_ref[0], mask_ref, w1_ref, t1_ref, wb1_ref, tb1_ref,
                  wb2_ref, tb2_ref, w2_ref, t2_ref, out_ref, H=H, W=W, c=c)


# ------------------------------------- wrapper --------------------------------------
def _tap_masks(H, W):
    """(8, HW) f32 validity masks for the 8 non-center taps of a zero-padded 3x3 conv."""
    HW = H * W
    hh = np.arange(HW) // W
    ww = np.arange(HW) % W
    rows = []
    for t in range(9):
        dy, dx = t // 3 - 1, t % 3 - 1
        if dy == 0 and dx == 0:
            continue
        ok = (hh + dy >= 0) & (hh + dy < H) & (ww + dx >= 0) & (ww + dx < W)
        rows.append(ok.astype(np.float32))
    return jnp.asarray(np.stack(rows, axis=0))


def affd_forward(x1_nchw, params, x2_nchw=None):
    N, cin, H, W = x1_nchw.shape
    HW = H * W
    cp, c2, c2p = params["c_pad"], params["c2"], params["c2_pad"]

    mask = _tap_masks(H, W)
    x1f = x1_nchw.reshape(N, cin, HW)

    def inv(shape):                      # grid-invariant (weight / mask) spec
        nd = len(shape)
        return pl.BlockSpec(shape, lambda n: (0,) * nd)

    weight_specs = [
        inv((8, HW)),                                    # tap boundary masks
        inv((2 * cp, cin)), inv((2 * cp, 1)),            # cv1 weight (scale-folded) + shift
        inv((cp, 9 * cp)), inv((cp, 1)),                 # bottleneck conv1 (im2col) + shift
        inv((cp, 9 * cp)), inv((cp, 1)),                 # bottleneck conv2 (im2col) + shift
        inv((c2p, 2 * cp)), inv((c2p, 1)),               # cv2 weight + shift
    ]
    weight_args = [mask, params["w1"], params["t1"], params["wb1"], params["tb1"],
                   params["wb2"], params["tb2"], params["w2"], params["t2"]]
    x_spec = pl.BlockSpec((1, cin, HW), lambda n: (n, 0, 0))

    if x2_nchw is None:
        kernel = functools.partial(_affd_kernel_single, H=H, W=W, c=cp)
        in_specs = [x_spec] + weight_specs
        args = [x1f] + weight_args
    else:
        x2f = x2_nchw.reshape(N, cin, HW)
        kernel = functools.partial(_affd_kernel_fused, H=H, W=W, c=cp)
        in_specs = ([pl.BlockSpec(memory_space=pltpu.MemorySpace.SMEM),  # nw (2,) softmax
                     x_spec, x_spec] + weight_specs)
        args = [params["nw"], x1f, x2f] + weight_args

    grid_spec = pltpu.PrefetchScalarGridSpec(
        num_scalar_prefetch=0,
        grid=(N,),
        in_specs=in_specs,
        out_specs=pl.BlockSpec((1, c2p, HW), lambda n: (n, 0, 0)),
    )
    out = pl.pallas_call(
        kernel,
        out_shape=jax.ShapeDtypeStruct((N, c2p, HW), jnp.float32),
        grid_spec=grid_spec,
        compiler_params=pltpu.CompilerParams(
            dimension_semantics=("parallel",),
            # 48 MiB: plenty for these shapes, and fits v7x's 64 MiB physical VMEM with
            # double-buffer headroom (v5e/v6e have 128 MiB and could go higher).
            vmem_limit_bytes=48 * 1024 * 1024),
    )(*args)
    if c2p != c2:
        out = out[:, :c2]
    return out.reshape(N, c2, H, W)


# --------------------------- host-side parameter folding ----------------------------
def _round_up(x, m):
    return (x + m - 1) // m * m


def fold_kernel_params(ref_params):
    """Fold BN scale into conv weights, pad channels to sublane multiples, cast weights
    to bf16.  Shifts stay f32."""
    (weight2, w_cv1, bn_cv1, w_b1, bn_b1, w_b2, bn_b2, w_cv2, bn_cv2, c) = ref_params
    eps = 1e-5
    cin = w_cv1.shape[1]
    c2 = w_cv2.shape[0]
    cp = _round_up(c, 8)
    c2p = _round_up(c2, 8)

    def scale_shift(bnp):
        gamma, beta, rmean, rvar = bnp
        scale = gamma / jnp.sqrt(rvar + eps)
        shift = beta - rmean * scale
        return scale, shift

    def pad_rows(m2d, rows):
        return jnp.pad(m2d, ((0, rows - m2d.shape[0]),) + ((0, 0),) * (m2d.ndim - 1))

    def pad_cols(m2d, cols):
        return jnp.pad(m2d, ((0, 0), (0, cols - m2d.shape[1])))

    nw = jax.nn.softmax(weight2).astype(jnp.float32)

    # cv1: fold scale into the 1x1 weight, split into a/b halves, pad each to cp rows.
    s1, t1 = scale_shift(bn_cv1)
    w1 = w_cv1[:, :, 0, 0] * s1[:, None]                                 # (2c, cin)
    w1_k = jnp.concatenate([pad_rows(w1[:c], cp), pad_rows(w1[c:], cp)], 0)
    t1_k = jnp.concatenate([pad_rows(t1[:c, None], cp), pad_rows(t1[c:, None], cp)], 0)

    # bottleneck 3x3 convs: fold scale, pad co/ci to cp, flatten tap-major (ci inner).
    def conv3x3(w, bnp):
        s, t = scale_shift(bnp)
        w = w * s[:, None, None, None]                                   # (c, c, 3, 3)
        w = jnp.pad(w, ((0, cp - w.shape[0]), (0, cp - w.shape[1]), (0, 0), (0, 0)))
        wm = jnp.transpose(w, (0, 2, 3, 1)).reshape(cp, 9 * cp)
        return wm.astype(jnp.bfloat16), pad_rows(t[:, None], cp)

    wb1_k, tb1_k = conv3x3(w_b1, bn_b1)
    wb2_k, tb2_k = conv3x3(w_b2, bn_b2)

    # cv2: fold scale, pad each K half to cp cols (matches the [m; b] stack), pad rows.
    s2, t2 = scale_shift(bn_cv2)
    w2 = w_cv2[:, :, 0, 0] * s2[:, None]                                 # (c2, 2c)
    w2_k = jnp.concatenate([pad_cols(w2[:, :c], cp), pad_cols(w2[:, c:], cp)], 1)
    w2_k = pad_rows(w2_k, c2p).astype(jnp.bfloat16)
    t2_k = pad_rows(t2[:, None], c2p)

    return dict(nw=nw,
                w1=w1_k.astype(jnp.bfloat16), t1=t1_k,
                wb1=wb1_k, tb1=tb1_k, wb2=wb2_k, tb2=tb2_k,
                w2=w2_k, t2=t2_k,
                c=c, c_pad=cp, c2=c2, c2_pad=c2p)


# ----------------------------- pure-JAX reference (f32) -----------------------------
def affd_reference(x1, x2, ref_params):
    (weight2, w_cv1, bn_cv1, w_b1, bn_b1, w_b2, bn_b2, w_cv2, bn_cv2, c) = ref_params

    def conv_bn_relu(x, w, bnp, pad):
        y = lax.conv_general_dilated(x, w, (1, 1), [(pad, pad), (pad, pad)],
                                     dimension_numbers=('NCHW', 'OIHW', 'NCHW'))
        gamma, beta, rmean, rvar = bnp
        scale = gamma / jnp.sqrt(rvar + 1e-5)
        shift = beta - rmean * scale
        return jax.nn.relu(y * scale[None, :, None, None] + shift[None, :, None, None])

    if x2 is None:
        x = x1
    else:
        nw = jax.nn.softmax(weight2)
        x = nw[0] * x1 + nw[1] * x2
    y1 = conv_bn_relu(x, w_cv1, bn_cv1, 0)
    a, b = y1[:, :c], y1[:, c:]
    h = conv_bn_relu(a, w_b1, bn_b1, 1)
    h = conv_bn_relu(h, w_b2, bn_b2, 1)
    m = a + h                                   # Bottleneck shortcut (c1 == c2, shortcut=True)
    cat = jnp.concatenate([m, b], axis=1)
    return conv_bn_relu(cat, w_cv2, bn_cv2, 0)


# ----------------------------- parameter construction -------------------------------
def make_ref_params(key, c1, c2, e=0.5):
    c = int(c2 * e)
    ks = jax.random.split(key, 9)
    weight2 = jax.random.normal(ks[0], (2,), jnp.float32)            # fusion parameter
    w_cv1 = 0.2 * jax.random.normal(ks[1], (2 * c, c1, 1, 1), jnp.float32)
    w_b1 = 0.2 * jax.random.normal(ks[2], (c, c, 3, 3), jnp.float32)
    w_b2 = 0.2 * jax.random.normal(ks[3], (c, c, 3, 3), jnp.float32)
    w_cv2 = 0.2 * jax.random.normal(ks[4], (c2, 2 * c, 1, 1), jnp.float32)

    def bn(k, ch):
        k1, k2, k3, k4 = jax.random.split(k, 4)
        gamma = 1.0 + 0.1 * jax.random.normal(k1, (ch,), jnp.float32)
        beta = 0.1 * jax.random.normal(k2, (ch,), jnp.float32)
        rmean = 0.1 * jax.random.normal(k3, (ch,), jnp.float32)
        rvar = 0.5 + jax.random.uniform(k4, (ch,), dtype=jnp.float32)
        return (gamma, beta, rmean, rvar)

    bn_cv1 = bn(ks[5], 2 * c)
    bn_b1 = bn(ks[6], c)
    bn_b2 = bn(ks[7], c)
    bn_cv2 = bn(ks[8], c2)
    return (weight2, w_cv1, bn_cv1, w_b1, bn_b1, w_b2, bn_b2, w_cv2, bn_cv2, c)


if __name__ == "__main__":
    N, C1, H, W = 2, 4, 16, 16        # AFFD(c1=4, c2=8, e=0.5) -> hidden c = 4
    C2 = 8
    key = jax.random.PRNGKey(0)
    kp, kx1, kx2 = jax.random.split(key, 3)

    ref_params = make_ref_params(kp, C1, C2, e=0.5)
    kparams = fold_kernel_params(ref_params)

    x1 = jax.random.normal(kx1, (N, C1, H, W), jnp.float32)
    x2 = jax.random.normal(kx2, (N, C1, H, W), jnp.float32)

    # two-input path (softmax-weighted fusion).  Kernel runs bf16 MXU inputs with f32
    # accumulation, so compare against the f32 reference with bf16-appropriate tolerance.
    out = jax.block_until_ready(affd_forward(x1, kparams, x2))
    ref = jax.block_until_ready(affd_reference(x1, x2, ref_params))
    np.testing.assert_allclose(np.asarray(out), np.asarray(ref), rtol=5e-2, atol=5e-2)

    # single-input path (x2=None -> x = x1 exactly)
    out1 = jax.block_until_ready(affd_forward(x1, kparams, None))
    ref1 = jax.block_until_ready(affd_reference(x1, None, ref_params))
    np.testing.assert_allclose(np.asarray(out1), np.asarray(ref1), rtol=5e-2, atol=5e-2)

    print("KERNEL_OK")
</pallas_src>

<mosaic_0001>
module attributes {stable_mosaic.version = 11 : i64} {
  func.func @_affd_kernel_fused(%arg0: i32, %arg1: memref<2xf32, #tpu.memory_space<smem>>, %arg2: memref<1x4x256xf32, #tpu.memory_space<vmem>>, %arg3: memref<1x4x256xf32, #tpu.memory_space<vmem>>, %arg4: memref<8x256xf32, #tpu.memory_space<vmem>>, %arg5: memref<16x4xbf16, #tpu.memory_space<vmem>>, %arg6: memref<16x1xf32, #tpu.memory_space<vmem>>, %arg7: memref<8x72xbf16, #tpu.memory_space<vmem>>, %arg8: memref<8x1xf32, #tpu.memory_space<vmem>>, %arg9: memref<8x72xbf16, #tpu.memory_space<vmem>>, %arg10: memref<8x1xf32, #tpu.memory_space<vmem>>, %arg11: memref<8x16xbf16, #tpu.memory_space<vmem>>, %arg12: memref<8x1xf32, #tpu.memory_space<vmem>>, %arg13: memref<1x8x256xf32, #tpu.memory_space<vmem>>) attributes {dimension_semantics = [#tpu.dimension_semantics<parallel>], iteration_bounds = array<i64: 2>, scalar_prefetch = 0 : i64, scratch_operands = 0 : i64, tpu.core_type = #tpu.core_type<tc>, window_params = [{transform_indices = @transform_0, window_bounds = array<i64: 2>}, {transform_indices = @transform_1, window_bounds = array<i64: 1, 4, 256>}, {transform_indices = @transform_2, window_bounds = array<i64: 1, 4, 256>}, {pipeline_mode = #tpu.pipeline_mode<synchronous>, transform_indices = @transform_3, window_bounds = array<i64: 8, 256>}, {pipeline_mode = #tpu.pipeline_mode<synchronous>, transform_indices = @transform_4, window_bounds = array<i64: 16, 4>}, {pipeline_mode = #tpu.pipeline_mode<synchronous>, transform_indices = @transform_5, window_bounds = array<i64: 16, 1>}, {pipeline_mode = #tpu.pipeline_mode<synchronous>, transform_indices = @transform_6, window_bounds = array<i64: 8, 72>}, {pipeline_mode = #tpu.pipeline_mode<synchronous>, transform_indices = @transform_7, window_bounds = array<i64: 8, 1>}, {pipeline_mode = #tpu.pipeline_mode<synchronous>, transform_indices = @transform_8, window_bounds = array<i64: 8, 72>}, {pipeline_mode = #tpu.pipeline_mode<synchronous>, transform_indices = @transform_9, window_bounds = array<i64: 8, 1>}, {pipeline_mode = #tpu.pipeline_mode<synchronous>, transform_indices = @transform_10, window_bounds = array<i64: 8, 16>}, {pipeline_mode = #tpu.pipeline_mode<synchronous>, transform_indices = @transform_11, window_bounds = array<i64: 8, 1>}, {transform_indices = @transform_12, window_bounds = array<i64: 1, 8, 256>}]} {
    %c0 = arith.constant 0 : index
    %0 = memref.load %arg1[%c0] : memref<2xf32, #tpu.memory_space<smem>>
    %c0_0 = arith.constant 0 : index
    %c0_1 = arith.constant 0 : index
    %c0_2 = arith.constant 0 : index
    %1 = vector.load %arg2[%c0_0, %c0_1, %c0_2] : memref<1x4x256xf32, #tpu.memory_space<vmem>>, vector<1x4x256xf32>
    %2 = vector.shape_cast %1 : vector<1x4x256xf32> to vector<4x256xf32>
    %3 = vector.broadcast %0 : f32 to vector<4x256xf32>
    %4 = arith.mulf %3, %2 : vector<4x256xf32>
    %c1 = arith.constant 1 : index
    %5 = memref.load %arg1[%c1] : memref<2xf32, #tpu.memory_space<smem>>
    %c0_3 = arith.constant 0 : index
    %c0_4 = arith.constant 0 : index
    %c0_5 = arith.constant 0 : index
    %6 = vector.load %arg3[%c0_3, %c0_4, %c0_5] : memref<1x4x256xf32, #tpu.memory_space<vmem>>, vector<1x4x256xf32>
    %7 = vector.shape_cast %6 : vector<1x4x256xf32> to vector<4x256xf32>
    %8 = vector.broadcast %5 : f32 to vector<4x256xf32>
    %9 = arith.mulf %8, %7 : vector<4x256xf32>
    %10 = arith.addf %4, %9 : vector<4x256xf32>
    %c0_6 = arith.constant 0 : index
    %c0_7 = arith.constant 0 : index
    %11 = vector.load %arg4[%c0_6, %c0_7] : memref<8x256xf32, #tpu.memory_space<vmem>>, vector<8x256xf32>
    %c0_8 = arith.constant 0 : index
    %c0_9 = arith.constant 0 : index
    %12 = vector.load %arg5[%c0_8, %c0_9] : memref<16x4xbf16, #tpu.memory_space<vmem>>, vector<16x4xbf16>
    %13 = arith.truncf %10 : vector<4x256xf32> to vector<4x256xbf16>
    %cst = arith.constant dense<0.000000e+00> : vector<16x256xf32>
    %14 = tpu.matmul %12, %13, %cst {dimension_numbers = #tpu.dot_dimension_numbers<[1], [0], [0], [1], [0, 0, 1, 1], [], []>} : vector<16x4xbf16>, vector<4x256xbf16>, vector<16x256xf32> -> vector<16x256xf32>
    %c0_10 = arith.constant 0 : index
    %c0_11 = arith.constant 0 : index
    %15 = vector.load %arg6[%c0_10, %c0_11] : memref<16x1xf32, #tpu.memory_space<vmem>>, vector<16x1xf32>
    %16 = vector.broadcast %15 : vector<16x1xf32> to vector<16x256xf32>
    %17 = arith.addf %14, %16 : vector<16x256xf32>
    %cst_12 = arith.constant 0.000000e+00 : f32
    %18 = vector.broadcast %cst_12 : f32 to vector<16x256xf32>
    %19 = arith.maximumf %17, %18 : vector<16x256xf32>
    %20 = vector.extract_strided_slice %19 {offsets = [0, 0], sizes = [8, 256], strides = [1, 1]} : vector<16x256xf32> to vector<8x256xf32>
    %21 = vector.extract_strided_slice %19 {offsets = [8, 0], sizes = [8, 256], strides = [1, 1]} : vector<16x256xf32> to vector<8x256xf32>
    %c0_13 = arith.constant 0 : index
    %c0_14 = arith.constant 0 : index
    %22 = vector.load %arg7[%c0_13, %c0_14] : memref<8x72xbf16, #tpu.memory_space<vmem>>, vector<8x72xbf16>
    %c17_i32 = arith.constant 17 : i32
    %23 = tpu.dynamic_rotate %20 by %c17_i32 dim 1 : vector<8x256xf32>, i32 -> vector<8x256xf32>
    %24 = vector.extract_strided_slice %11 {offsets = [0, 0], sizes = [1, 256], strides = [1, 1]} : vector<8x256xf32> to vector<1x256xf32>
    %25 = vector.broadcast %24 : vector<1x256xf32> to vector<8x256xf32>
    %26 = arith.mulf %23, %25 : vector<8x256xf32>
    %c16_i32 = arith.constant 16 : i32
    %27 = tpu.dynamic_rotate %20 by %c16_i32 dim 1 : vector<8x256xf32>, i32 -> vector<8x256xf32>
    %28 = vector.extract_strided_slice %11 {offsets = [1, 0], sizes = [1, 256], strides = [1, 1]} : vector<8x256xf32> to vector<1x256xf32>
    %29 = vector.broadcast %28 : vector<1x256xf32> to vector<8x256xf32>
    %30 = arith.mulf %27, %29 : vector<8x256xf32>
    %c15_i32 = arith.constant 15 : i32
    %31 = tpu.dynamic_rotate %20 by %c15_i32 dim 1 : vector<8x256xf32>, i32 -> vector<8x256xf32>
    %32 = vector.extract_strided_slice %11 {offsets = [2, 0], sizes = [1, 256], strides = [1, 1]} : vector<8x256xf32> to vector<1x256xf32>
    %33 = vector.broadcast %32 : vector<1x256xf32> to vector<8x256xf32>
    %34 = arith.mulf %31, %33 : vector<8x256xf32>
    %c1_i32 = arith.constant 1 : i32
    %35 = tpu.dynamic_rotate %20 by %c1_i32 dim 1 : vector<8x256xf32>, i32 -> vector<8x256xf32>
    %36 = vector.extract_strided_slice %11 {offsets = [3, 0], sizes = [1, 256], strides = [1, 1]} : vector<8x256xf32> to vector<1x256xf32>
    %37 = vector.broadcast %36 : vector<1x256xf32> to vector<8x256xf32>
    %38 = arith.mulf %35, %37 : vector<8x256xf32>
    %c255_i32 = arith.constant 255 : i32
    %39 = tpu.dynamic_rotate %20 by %c255_i32 dim 1 : vector<8x256xf32>, i32 -> vector<8x256xf32>
    %40 = vector.extract_strided_slice %11 {offsets = [4, 0], sizes = [1, 256], strides = [1, 1]} : vector<8x256xf32> to vector<1x256xf32>
    %41 = vector.broadcast %40 : vector<1x256xf32> to vector<8x256xf32>
    %42 = arith.mulf %39, %41 : vector<8x256xf32>
    %c241_i32 = arith.constant 241 : i32
    %43 = tpu.dynamic_rotate %20 by %c241_i32 dim 1 : vector<8x256xf32>, i32 -> vector<8x256xf32>
    %44 = vector.extract_strided_slice %11 {offsets = [5, 0], sizes = [1, 256], strides = [1, 1]} : vector<8x256xf32> to vector<1x256xf32>
    %45 = vector.broadcast %44 : vector<1x256xf32> to vector<8x256xf32>
    %46 = arith.mulf %43, %45 : vector<8x256xf32>
    %c240_i32 = arith.constant 240 : i32
    %47 = tpu.dynamic_rotate %20 by %c240_i32 dim 1 : vector<8x256xf32>, i32 -> vector<8x256xf32>
    %48 = vector.extract_strided_slice %11 {offsets = [6, 0], sizes = [1, 256], strides = [1, 1]} : vector<8x256xf32> to vector<1x256xf32>
    %49 = vector.broadcast %48 : vector<1x256xf32> to vector<8x256xf32>
    %50 = arith.mulf %47, %49 : vector<8x256xf32>
    %c239_i32 = arith.constant 239 : i32
    %51 = tpu.dynamic_rotate %20 by %c239_i32 dim 1 : vector<8x256xf32>, i32 -> vector<8x256xf32>
    %52 = vector.extract_strided_slice %11 {offsets = [7, 0], sizes = [1, 256], strides = [1, 1]} : vector<8x256xf32> to vector<1x256xf32>
    %53 = vector.broadcast %52 : vector<1x256xf32> to vector<8x256xf32>
    %54 = arith.mulf %51, %53 : vector<8x256xf32>
    %55 = tpu.concatenate %26, %30, %34, %38, %20, %42, %46, %50, %54 in 0 : vector<8x256xf32>, vector<8x256xf32>, vector<8x256xf32>, vector<8x256xf32>, vector<8x256xf32>, vector<8x256xf32>, vector<8x256xf32>, vector<8x256xf32>, vector<8x256xf32> -> vector<72x256xf32>
    %56 = arith.truncf %55 : vector<72x256xf32> to vector<72x256xbf16>
    %cst_15 = arith.constant dense<0.000000e+00> : vector<8x256xf32>
    %57 = tpu.matmul %22, %56, %cst_15 {dimension_numbers = #tpu.dot_dimension_numbers<[1], [0], [0], [1], [0, 0, 1, 1], [], []>} : vector<8x72xbf16>, vector<72x256xbf16>, vector<8x256xf32> -> vector<8x256xf32>
    %c0_16 = arith.constant 0 : index
    %c0_17 = arith.constant 0 : index
    %58 = vector.load %arg8[%c0_16, %c0_17] : memref<8x1xf32, #tpu.memory_space<vmem>>, vector<8x1xf32>
    %59 = vector.broadcast %58 : vector<8x1xf32> to vector<8x256xf32>
    %60 = arith.addf %57, %59 : vector<8x256xf32>
    %cst_18 = arith.constant 0.000000e+00 : f32
    %61 = vector.broadcast %cst_18 : f32 to vector<8x256xf32>
    %62 = arith.maximumf %60, %61 : vector<8x256xf32>
    %c0_19 = arith.constant 0 : index
    %c0_20 = arith.constant 0 : index
    %63 = vector.load %arg9[%c0_19, %c0_20] : memref<8x72xbf16, #tpu.memory_space<vmem>>, vector<8x72xbf16>
    %c17_i32_21 = arith.constant 17 : i32
    %64 = tpu.dynamic_rotate %62 by %c17_i32_21 dim 1 : vector<8x256xf32>, i32 -> vector<8x256xf32>
    %65 = vector.extract_strided_slice %11 {offsets = [0, 0], sizes = [1, 256], strides = [1, 1]} : vector<8x256xf32> to vector<1x256xf32>
    %66 = vector.broadcast %65 : vector<1x256xf32> to vector<8x256xf32>
    %67 = arith.mulf %64, %66 : vector<8x256xf32>
    %c16_i32_22 = arith.constant 16 : i32
    %68 = tpu.dynamic_rotate %62 by %c16_i32_22 dim 1 : vector<8x256xf32>, i32 -> vector<8x256xf32>
    %69 = vector.extract_strided_slice %11 {offsets = [1, 0], sizes = [1, 256], strides = [1, 1]} : vector<8x256xf32> to vector<1x256xf32>
    %70 = vector.broadcast %69 : vector<1x256xf32> to vector<8x256xf32>
    %71 = arith.mulf %68, %70 : vector<8x256xf32>
    %c15_i32_23 = arith.constant 15 : i32
    %72 = tpu.dynamic_rotate %62 by %c15_i32_23 dim 1 : vector<8x256xf32>, i32 -> vector<8x256xf32>
    %73 = vector.extract_strided_slice %11 {offsets = [2, 0], sizes = [1, 256], strides = [1, 1]} : vector<8x256xf32> to vector<1x256xf32>
    %74 = vector.broadcast %73 : vector<1x256xf32> to vector<8x256xf32>
    %75 = arith.mulf %72, %74 : vector<8x256xf32>
    %c1_i32_24 = arith.constant 1 : i32
    %76 = tpu.dynamic_rotate %62 by %c1_i32_24 dim 1 : vector<8x256xf32>, i32 -> vector<8x256xf32>
    %77 = vector.extract_strided_slice %11 {offsets = [3, 0], sizes = [1, 256], strides = [1, 1]} : vector<8x256xf32> to vector<1x256xf32>
    %78 = vector.broadcast %77 : vector<1x256xf32> to vector<8x256xf32>
    %79 = arith.mulf %76, %78 : vector<8x256xf32>
    %c255_i32_25 = arith.constant 255 : i32
    %80 = tpu.dynamic_rotate %62 by %c255_i32_25 dim 1 : vector<8x256xf32>, i32 -> vector<8x256xf32>
    %81 = vector.extract_strided_slice %11 {offsets = [4, 0], sizes = [1, 256], strides = [1, 1]} : vector<8x256xf32> to vector<1x256xf32>
    %82 = vector.broadcast %81 : vector<1x256xf32> to vector<8x256xf32>
    %83 = arith.mulf %80, %82 : vector<8x256xf32>
    %c241_i32_26 = arith.constant 241 : i32
    %84 = tpu.dynamic_rotate %62 by %c241_i32_26 dim 1 : vector<8x256xf32>, i32 -> vector<8x256xf32>
    %85 = vector.extract_strided_slice %11 {offsets = [5, 0], sizes = [1, 256], strides = [1, 1]} : vector<8x256xf32> to vector<1x256xf32>
    %86 = vector.broadcast %85 : vector<1x256xf32> to vector<8x256xf32>
    %87 = arith.mulf %84, %86 : vector<8x256xf32>
    %c240_i32_27 = arith.constant 240 : i32
    %88 = tpu.dynamic_rotate %62 by %c240_i32_27 dim 1 : vector<8x256xf32>, i32 -> vector<8x256xf32>
    %89 = vector.extract_strided_slice %11 {offsets = [6, 0], sizes = [1, 256], strides = [1, 1]} : vector<8x256xf32> to vector<1x256xf32>
    %90 = vector.broadcast %89 : vector<1x256xf32> to vector<8x256xf32>
    %91 = arith.mulf %88, %90 : vector<8x256xf32>
    %c239_i32_28 = arith.constant 239 : i32
    %92 = tpu.dynamic_rotate %62 by %c239_i32_28 dim 1 : vector<8x256xf32>, i32 -> vector<8x256xf32>
    %93 = vector.extract_strided_slice %11 {offsets = [7, 0], sizes = [1, 256], strides = [1, 1]} : vector<8x256xf32> to vector<1x256xf32>
    %94 = vector.broadcast %93 : vector<1x256xf32> to vector<8x256xf32>
    %95 = arith.mulf %92, %94 : vector<8x256xf32>
    %96 = tpu.concatenate %67, %71, %75, %79, %62, %83, %87, %91, %95 in 0 : vector<8x256xf32>, vector<8x256xf32>, vector<8x256xf32>, vector<8x256xf32>, vector<8x256xf32>, vector<8x256xf32>, vector<8x256xf32>, vector<8x256xf32>, vector<8x256xf32> -> vector<72x256xf32>
    %97 = arith.truncf %96 : vector<72x256xf32> to vector<72x256xbf16>
    %cst_29 = arith.constant dense<0.000000e+00> : vector<8x256xf32>
    %98 = tpu.matmul %63, %97, %cst_29 {dimension_numbers = #tpu.dot_dimension_numbers<[1], [0], [0], [1], [0, 0, 1, 1], [], []>} : vector<8x72xbf16>, vector<72x256xbf16>, vector<8x256xf32> -> vector<8x256xf32>
    %c0_30 = arith.constant 0 : index
    %c0_31 = arith.constant 0 : index
    %99 = vector.load %arg10[%c0_30, %c0_31] : memref<8x1xf32, #tpu.memory_space<vmem>>, vector<8x1xf32>
    %100 = vector.broadcast %99 : vector<8x1xf32> to vector<8x256xf32>
    %101 = arith.addf %98, %100 : vector<8x256xf32>
    %cst_32 = arith.constant 0.000000e+00 : f32
    %102 = vector.broadcast %cst_32 : f32 to vector<8x256xf32>
    %103 = arith.maximumf %101, %102 : vector<8x256xf32>
    %104 = arith.addf %20, %103 : vector<8x256xf32>
    %105 = tpu.concatenate %104, %21 in 0 : vector<8x256xf32>, vector<8x256xf32> -> vector<16x256xf32>
    %106 = arith.truncf %105 : vector<16x256xf32> to vector<16x256xbf16>
    %c0_33 = arith.constant 0 : index
    %c0_34 = arith.constant 0 : index
    %107 = vector.load %arg11[%c0_33, %c0_34] : memref<8x16xbf16, #tpu.memory_space<vmem>>, vector<8x16xbf16>
    %cst_35 = arith.constant dense<0.000000e+00> : vector<8x256xf32>
    %108 = tpu.matmul %107, %106, %cst_35 {dimension_numbers = #tpu.dot_dimension_numbers<[1], [0], [0], [1], [0, 0, 1, 1], [], []>} : vector<8x16xbf16>, vector<16x256xbf16>, vector<8x256xf32> -> vector<8x256xf32>
    %c0_36 = arith.constant 0 : index
    %c0_37 = arith.constant 0 : index
    %109 = vector.load %arg12[%c0_36, %c0_37] : memref<8x1xf32, #tpu.memory_space<vmem>>, vector<8x1xf32>
    %110 = vector.broadcast %109 : vector<8x1xf32> to vector<8x256xf32>
    %111 = arith.addf %108, %110 : vector<8x256xf32>
    %cst_38 = arith.constant 0.000000e+00 : f32
    %112 = vector.broadcast %cst_38 : f32 to vector<8x256xf32>
    %113 = arith.maximumf %111, %112 : vector<8x256xf32>
    %c0_39 = arith.constant 0 : index
    %c0_40 = arith.constant 0 : index
    %c0_41 = arith.constant 0 : index
    %114 = vector.load %arg13[%c0_39, %c0_40, %c0_41] : memref<1x8x256xf32, #tpu.memory_space<vmem>>, vector<1x8x256xf32>
    %115 = vector.shape_cast %114 : vector<1x8x256xf32> to vector<8x256xf32>
    %116 = vector.shape_cast %113 : vector<8x256xf32> to vector<1x8x256xf32>
    tpu.vector_store %arg13[%c0_39, %c0_40, %c0_41], %116 {strides = array<i32>} : memref<1x8x256xf32, #tpu.memory_space<vmem>>, vector<1x8x256xf32>,
    return
  }
  func.func @transform_0(%arg0: i32) -> i32 {
    %c0_i32 = arith.constant 0 : i32
    %c0_i32_0 = arith.constant 0 : i32
    return %c0_i32 : i32
  }
  func.func @transform_1(%arg0: i32) -> (i32, i32, i32) {
    %c0_i32 = arith.constant 0 : i32
    %c0_i32_0 = arith.constant 0 : i32
    %c0_i32_1 = arith.constant 0 : i32
    return %arg0, %c0_i32, %c0_i32_0 : i32, i32, i32
  }
  func.func @transform_2(%arg0: i32) -> (i32, i32, i32) {
    %c0_i32 = arith.constant 0 : i32
    %c0_i32_0 = arith.constant 0 : i32
    %c0_i32_1 = arith.constant 0 : i32
    return %arg0, %c0_i32, %c0_i32_0 : i32, i32, i32
  }
  func.func @transform_3(%arg0: i32) -> (i32, i32) {
    %c0_i32 = arith.constant 0 : i32
    %c0_i32_0 = arith.constant 0 : i32
    %c0_i32_1 = arith.constant 0 : i32
    return %c0_i32, %c0_i32_0 : i32, i32
  }
  func.func @transform_4(%arg0: i32) -> (i32, i32) {
    %c0_i32 = arith.constant 0 : i32
    %c0_i32_0 = arith.constant 0 : i32
    %c0_i32_1 = arith.constant 0 : i32
    return %c0_i32, %c0_i32_0 : i32, i32
  }
  func.func @transform_5(%arg0: i32) -> (i32, i32) {
    %c0_i32 = arith.constant 0 : i32
    %c0_i32_0 = arith.constant 0 : i32
    %c0_i32_1 = arith.constant 0 : i32
    return %c0_i32, %c0_i32_0 : i32, i32
  }
  func.func @transform_6(%arg0: i32) -> (i32, i32) {
    %c0_i32 = arith.constant 0 : i32
    %c0_i32_0 = arith.constant 0 : i32
    %c0_i32_1 = arith.constant 0 : i32
    return %c0_i32, %c0_i32_0 : i32, i32
  }
  func.func @transform_7(%arg0: i32) -> (i32, i32) {
    %c0_i32 = arith.constant 0 : i32
    %c0_i32_0 = arith.constant 0 : i32
    %c0_i32_1 = arith.constant 0 : i32
    return %c0_i32, %c0_i32_0 : i32, i32
  }
  func.func @transform_8(%arg0: i32) -> (i32, i32) {
    %c0_i32 = arith.constant 0 : i32
    %c0_i32_0 = arith.constant 0 : i32
    %c0_i32_1 = arith.constant 0 : i32
    return %c0_i32, %c0_i32_0 : i32, i32
  }
  func.func @transform_9(%arg0: i32) -> (i32, i32) {
    %c0_i32 = arith.constant 0 : i32
    %c0_i32_0 = arith.constant 0 : i32
    %c0_i32_1 = arith.constant 0 : i32
    return %c0_i32, %c0_i32_0 : i32, i32
  }
  func.func @transform_10(%arg0: i32) -> (i32, i32) {
    %c0_i32 = arith.constant 0 : i32
    %c0_i32_0 = arith.constant 0 : i32
    %c0_i32_1 = arith.constant 0 : i32
    return %c0_i32, %c0_i32_0 : i32, i32
  }
  func.func @transform_11(%arg0: i32) -> (i32, i32) {
    %c0_i32 = arith.constant 0 : i32
    %c0_i32_0 = arith.constant 0 : i32
    %c0_i32_1 = arith.constant 0 : i32
    return %c0_i32, %c0_i32_0 : i32, i32
  }
  func.func @transform_12(%arg0: i32) -> (i32, i32, i32) {
    %c0_i32 = arith.constant 0 : i32
    %c0_i32_0 = arith.constant 0 : i32
    %c0_i32_1 = arith.constant 0 : i32
    return %arg0, %c0_i32, %c0_i32_0 : i32, i32, i32
  }
}

</mosaic_0001>

<bundles_post_ra>
// kernel: tpu_custom_call.1
= control target key start
LH: loop header
LB: loop body
LE: loop exit
PB: predicated region body
PF: predicated region fallthrough
CT: control target
= control target key end

     0   :  { %s1727_s0 = inlined_call_operand.vmem [shape: f32[2], index: 0, kind: input, shape index: {}]   ;;  %s1728_s1 = inlined_call_operand.vmem [shape: f32[2,4,256], index: 1, kind: input, shape index: {}]   ;;  %s1729_s2 = inlined_call_operand.vmem [shape: f32[2,4,256], index: 2, kind: input, shape index: {}]   ;;  %s1730_s3 = inlined_call_operand.vmem [shape: f32[8,256], index: 3, kind: input, shape index: {}]   ;;  %s1731_s4 = inlined_call_operand.vmem [shape: bf16[16,4], index: 4, kind: input, shape index: {}]   ;;  %s1732_s5 = inlined_call_operand.vmem [shape: f32[16,1], index: 5, kind: input, shape index: {}]   ;;  %s1733_s6 = inlined_call_operand.hbm [shape: bf16[8,72], index: 6, kind: input, shape index: {}]   ;;  %s1734_s7 = inlined_call_operand.vmem [shape: f32[8,1], index: 7, kind: input, shape index: {}]   ;;  %s1735_s8 = inlined_call_operand.vmem [shape: bf16[8,72], index: 8, kind: input, shape index: {}]   ;;  %s1736_s9 = inlined_call_operand.vmem [shape: f32[8,1], index: 9, kind: input, shape index: {}]   ;;  %s1737_s10 = inlined_call_operand.hbm [shape: bf16[8,16], index: 10, kind: input, shape index: {}]   ;;  %s1738_s11 = inlined_call_operand.vmem [shape: f32[8,1], index: 11, kind: input, shape index: {}]   ;;  %s1739_s12 = inlined_call_operand.hbm [shape: f32[2,8,256], index: 12, kind: output, shape index: {}]  }
   0x1   :  { %1743 = sst [smem:[#allocation17_spill]] %s1727_s0 }
   0x2   :  { %17 = vsyncpa [#allocation5], 0 }
   0x3   :  { %18 = vsyncpa [#allocation3], 0 }
   0x4   :  { %19 = vsyncpa [#allocation8], 0 }
   0x5   :  { %20 = vsyncpa [#allocation4], 0 }
   0x6   :  { %22 = vsyncpa [#allocation4 + $0x1], 0  ;;  %s1336_s21 = smov 0   ;;  %s1338_s22 = smov 0  }
   0x7   :  { %s1340_s23 = smov 0   ;;  %s1342_s24 = smov 0  }
   0x8 LB: > { %1744 = sst [smem:[#allocation14_spill]] %s1253_s23  ;;  %s1357_s25 = sadd.s32 4294967295, %s1257_s24   ;;  %s1257_s24 = sphi %s1342_s24, %s1751_s24   ;;  %s1253_s23 = sphi %s1340_s23, %s1753_s23   ;;  %s1249_s22 = sphi %s1338_s22, %s1755_s22   ;;  %s1245_s21 = sphi %s1336_s21, %s1754_s21  }
   0x9   : > { %s989_s26 = sadd.s32 4294967294, %s1257_s24   ;;  %s1361_s27 = sadd.s32 1, %s1257_s24  }
   0xa   : > { %1745 = sst [smem:[#allocation15_spill]] %s1361_s27  ;;  %s297_s28 = sadd.s32 1, %s1253_s23 }
   0xb   : > { %s294_s29 = ssub.s32 %s1257_s24, %s1361_s27  ;;  %p307_p0 = scmp.ne.s32.totalorder %s1253_s23, %s1249_s22 }
   0xc   : > { %p295_p1 = scmp.eq.s32.totalorder %s294_s29, 0  ;;  %p308_p2 = scmp.eq.s32.totalorder %s1357_s25, 1 }
   0xd   : > { %p313_p3 = scmp.ne.s32.totalorder %s1249_s22, %s1245_s21  ;;  %p314_p4 = scmp.eq.s32.totalorder %s989_s26, 1 }
   0xe   : > { %s1372_s30 = scalar_select %p295_p1, %s1253_s23, %s297_s28  }
   0xf   : > { %p1374_p5 = por %p308_p2, %p307_p0  ;;  %p1378_p6 = por %p314_p4, %p313_p3 }
  0x10   : > { %1746 = sst [smem:[#allocation16_spill]] %s1372_s30  ;;  %p990_p7 = scmp.ge.s32.totalorder %s1257_s24, 1 }
  0x11   : > { %p321_p8 = scmp.lt.s32.totalorder %s1257_s24, 3  ;;  %p1054_p9 = scmp.eq.s32.totalorder %s1357_s25, 0 }
  0x12   : > { %s1750_s0 = sld [smem:[#allocation17_spill]]  ;;  %s352_s26 = sshll.u32 %s1733_s6, 4  ;;  %s353_s26 = int_to_ptr.hbm [resolvable:$true] %s352_s26 }
  0x13   : > { %p1385_p10 = pnand %p990_p7, %p321_p8  ;;  %s1259_s28 = smov [#allocation6]  }
  0x14   : > { %s354_s29 = sshll.u32 %s1259_s28, 4  ;;  %s373_s27 = sshll.u32 %s1737_s10, 4  ;;  %s355_s29 = int_to_ptr.vmem [resolvable:$true] %s354_s29  ;;  %s374_s27 = int_to_ptr.hbm [resolvable:$true] %s373_s27 }
  0x15   : > { %p1040_p11 = pneg %p1385_p10  ;;  %s1260_s16 = smov [#allocation2]  }
  0x16   : > { %s1261_s17 = smov [#allocation7]  }
  0x17   : > { %p1041_p12 = pnand %p1054_p9, %p1040_p11  ;;  %407 = sbr.rel (%p1385_p10) target bundleno = 930 (0x3a2), region = 68 }
  0x18   : > { %s333_s18 = sshll.u32 %s1750_s0, 4  ;;  %s375_s0 = sshll.u32 %s1261_s17, 4  ;;  %s334_s18 = int_to_ptr.vmem [resolvable:$true] %s333_s18  ;;  %s376_s0 = int_to_ptr.vmem [resolvable:$true] %s375_s0 }
  0x19   : > { %1043 = dma.vmem_to_smem (!%p1041_p12), %s334_s18, 16, %s1260_s16, [#allocation5]  }
  0x1a   : > { %1046 = dma.hbm_to_vmem [thread:$0]  (!%p1041_p12), %s353_s26, 64, %s355_s29, [#allocation3]  }
  0x1b   : > { %1049 = dma.hbm_to_vmem [thread:$0]  (!%p1041_p12), %s374_s27, 64, %s376_s0, [#allocation8]  }
  0x1c   : > { %1228 = dma.done.wait (%p1054_p9), [#allocation5], 16  }
  0x1d   : > { %1230 = vsyncadd (%p1054_p9), [#allocation5], 4294967280 }
  0x1e   : > { %1232 = dma.done.wait (%p1054_p9), [#allocation3], 64  }
  0x1f   : > { %1234 = vsyncadd (%p1054_p9), [#allocation3], 4294967232 }
  0x20   : > { %1236 = dma.done.wait (%p1054_p9), [#allocation8], 64  }
  0x21   : > { %1238 = vsyncadd (%p1054_p9), [#allocation8], 4294967232 }
  0x22   : > { %424 = sfence }
  0x23   : > { %p466_p13 = scmp.lt.s32.totalorder %s1357_s25, 1  ;;  %s477_s0 = sld [smem:[#allocation2]]  ;;  %v498_v0 = vld [vmem:[%s1732_s5] sm:$0xff]  ;;  %v1262_v1 = vmov 0   ;;  %vm519_vm0 = vcmask 1041408   ;;  %vm515_vm1 = vcmask 31744   ;;  %v563_v23 = vlaneseq }
  0x24   : > { %s1004_s23 = sld [smem:[#allocation2 + $0x1]]  ;;  %1105 = vset.pattern.permute.xlu0 %v1262_v1  ;;  %1106 = vset.pattern.permute.xlu2 %v1262_v1  ;;  %v1024_v15 = vld [vmem:[%s1731_s4] sm:$0xff]  ;;  %s1265_s30 = smov 112   ;;  %v1476_v27 = vld [vmem:[%s1730_s3 + $0x8] sm:$0xff]  ;;  %vm669_vm3 = vcmask 1043456   ;;  %vm665_vm11 = vcmask 588800  }
  0x25   : > { %s467_s15 = scalar_select %p466_p13, %s1357_s25, 1  ;;  %502 = vperm.xlu0 %1105, %v498_v0   ;;  %1107 = vset.pattern.permute.xlu1 %v1262_v1  ;;  %v1466_v25 = vand.u32 127, %v563_v23  ;;  %v1471_v26 = vld [vmem:[%s1730_s3] sm:$0xff]  ;;  %v646_v29 = vperm.slane %v1476_v27, 7  ;;  %v624_v40 = vperm.slane %v1476_v27, 5  ;;  %v635_v44 = vperm.slane %v1476_v27, 6 }
  0x26   : > { %s1268_s19 = smov 1   ;;  %s1269_s20 = smov 17   ;;  %v645_v28 = vperm.slane %v1471_v26, 7  ;;  %v623_v39 = vperm.slane %v1471_v26, 5  ;;  %v634_v43 = vperm.slane %v1471_v26, 6  ;;  %v612_v57 = vperm.slane %v1471_v26, 4 }
  0x27   : > { %s1022_s18 = sshll.u32 %s467_s15, 3  ;;  %s1266_s15 = smov 127   ;;  %vm642_vm2 = vcmp.lt.s32.totalorder %v1466_v25, 111  ;;  %vm620_vm4 = vcmp.lt.s32.totalorder %v1466_v25, 113  ;;  %vm631_vm5 = vcmp.lt.s32.totalorder %v1466_v25, 112  ;;  %vm609_vm6 = vcmp.lt.s32.totalorder %v1466_v25, 127 }
  0x28   : > { %s470_s26 = scalar_lea.vmem %s1728_s1, %s1022_s18  ;;  %s475_s16 = scalar_lea.vmem %s1729_s2, %s1022_s18  ;;  %v613_v58 = vperm.slane %v1476_v27, 4  ;;  %v659_v0 = vld [vmem:[%s1734_s7] sm:$0xff]  ;;  %vm587_vm7 = vcmp.lt.s32.totalorder %v1466_v25, 15  ;;  %vm598_vm8 = vcmp.lt.s32.totalorder %v1466_v25, 1  ;;  %vm565_vm9 = vcmp.lt.s32.totalorder %v1466_v25, 17 }
  0x29   : > { %v478_v2 = vld [vmem:[%s470_s26] sm:$0xff]  ;;  %v479_v3 = vstv %s477_s0  ;;  %s1263_s0 = smov 113   ;;  %s1267_s18 = smov 15   ;;  %vm576_vm10 = vcmp.lt.s32.totalorder %v1466_v25, 16  ;;  %vm833_vm12 = vcmask 130048  }
  0x2a   : > { %v482_v4 = vld [vmem:[%s475_s16] sm:$0xff]  ;;  %v480_v5 = vmul.f32 %v479_v3, %v478_v2  ;;  %v483_v6 = vstv %s1004_s23  ;;  %s1264_s23 = smov 111   ;;  %s1270_s26 = smov 16  }
  0x2b   : > { %v484_v7 = vmul.f32 %v483_v6, %v482_v4  ;;  %v591_v6 = vperm.slane %v1476_v27, 2  ;;  %v704_v25 = vld [vmem:[%s1735_s8] sm:$0xf]  ;;  %s463_s29 = sand.u32 1, %s1249_s22   ;;  %s1025_s17 = sshll.u32 %s1357_s25, 4 }
  0x2c   : > { %s999_s16 = sshll.u32 %s463_s29, 4  ;;  %s868_s25 = scalar_lea.sflag [#allocation4], %s463_s29 }
  0x2d   : > { %v485_v8 = vadd.f32 %v484_v7, %v480_v5  ;;  %v590_v5 = vperm.slane %v1471_v26, 2  ;;  %v601_v7 = vperm.slane %v1471_v26, 3 }
  0x2f   : > { %491 = vst [vmem:[#allocation1] ss:$2 sm:$0xff] %v485_v8  ;;  %v602_v8 = vperm.slane %v1476_v27, 3 }
  0x36   : > { %v492_v9 = vld.sshfl [vmem:[#allocation1] sm:$0xff pattern:$0x75316420]  ;;  %v493_v10 = vld.sshfl [vmem:[#allocation1 + $0x8] sm:$0xff pattern:$0x75316420] }
  0x37   : > { %v496_v11 = vpack.c.bf16 %v492_v9, %v492_v9  ;;  %v497_v12 = vpack.c.bf16 %v493_v10, %v493_v10 }
  0x39   : > { %v521_v13 = vsel %vm519_vm0, %v496_v11, 0  ;;  %v524_v14 = vsel %vm519_vm0, %v497_v12, 0 }
  0x3a   : > { %533 = vmatpush.bf16.msra.mxu0 %v521_v13  ;;  %547 = vmatpush.bf16.msra.mxu1 %v524_v14 }
  0x3d   : > { %1009 = vmatmul.msk.bf16.vlgmr.msra.gmra.mxu0 %vm515_vm1, %v1024_v15  ;;  %1010 = vmatmul.msk.bf16.vlgmr.msra.gmra.mxu1 %vm515_vm1, %v1024_v15 }
  0x97   : > { %v503_v16 = vpop.permute.xlu0 %502 }
  0xba   : > { %v535_v17 = vpop.f32.mrf.mxu0  ;;  %v549_v18 = vpop.f32.mrf.mxu1 }
  0xbb   : > { %v536_v19 = vadd.f32 %v535_v17, %v503_v16  ;;  %v550_v20 = vadd.f32 %v549_v18, %v503_v16 }
  0xbd   : > { %v1430_v21 = vmax.f32 %v536_v19, 0.0  ;;  %v1432_v22 = vmax.f32 %v550_v20, 0.0 }
  0xbf   : > { %618 = vrot.lane.b32.xlu2 %v1432_v22, %s1263_s0  ;;  %640 = vrot.lane.b32.xlu1 %v1432_v22, %s1264_s23 }
  0xc0   : > { %638 = vrot.lane.b32.xlu0 %v1430_v21, %s1264_s23 }
  0xc7   : > { %627 = vrot.lane.b32.xlu2 %v1430_v21, %s1265_s30  ;;  %616 = vrot.lane.b32.xlu1 %v1430_v21, %s1263_s0 }
  0xc8   : > { %629 = vrot.lane.b32.xlu0 %v1432_v22, %s1265_s30 }
  0xcf   : > { %607 = vrot.lane.b32.xlu2 %v1432_v22, %s1266_s15  ;;  %605 = vrot.lane.b32.xlu1 %v1430_v21, %s1266_s15 }
  0xd0   : > { %583 = vrot.lane.b32.xlu0 %v1430_v21, %s1267_s18 }
  0xd7   : > { %594 = vrot.lane.b32.xlu2 %v1430_v21, %s1268_s19  ;;  %585 = vrot.lane.b32.xlu1 %v1432_v22, %s1267_s18 }
  0xd8   : > { %596 = vrot.lane.b32.xlu0 %v1432_v22, %s1268_s19 }
  0xdf   : > { %561 = vrot.lane.b32.xlu2 %v1432_v22, %s1269_s20  ;;  %559 = vrot.lane.b32.xlu1 %v1430_v21, %s1269_s20 }
  0xe0   : > { %572 = vrot.lane.b32.xlu0 %v1430_v21, %s1270_s26 }
  0xe7   : > { %574 = vrot.lane.b32.xlu1 %v1432_v22, %s1270_s26  ;;  %662 = vperm.xlu2 %1106, %v659_v0   ;;  %v827_v0 = vld [vmem:[%s1738_s11] sm:$0xff] }
 0x119   : > { %v619_v24 = vpop.permute.xlu2 %618 }
 0x121   : > { %v628_v36 = vpop.permute.xlu2 %627 }
 0x129   : > { %v608_v59 = vpop.permute.xlu2 %607 }
 0x131   : > { %v641_v30 = vpop.permute.xlu1 %640  ;;  %v595_v10 = vpop.permute.xlu2 %594 }
 0x132   : > { %v639_v31 = vpop.permute.xlu0 %638 }
 0x133   : > { %v643_v32 = vsel %vm642_vm2, %v639_v31, %v641_v30  ;;  %v644_v33 = vsel %vm642_vm2, %v641_v30, %v639_v31  ;;  %v568_v30 = vperm.slane %v1471_v26, 0 }
 0x134   : > { %v647_v34 = vmul.f32 %v645_v28, %v643_v32  ;;  %v648_v35 = vmul.f32 %v646_v29, %v644_v33  ;;  %v569_v32 = vperm.slane %v1476_v27, 0  ;;  %v579_v33 = vperm.slane %v1471_v26, 1 }
 0x136   : > { %v657_v37 = vpack.c.bf16 %v647_v34, %v647_v34  ;;  %v658_v38 = vpack.c.bf16 %v648_v35, %v648_v35  ;;  %v580_v34 = vperm.slane %v1476_v27, 1 }
 0x138   : > { %v671_v41 = vsel %vm669_vm3, %v657_v37, 0  ;;  %v674_v42 = vsel %vm669_vm3, %v658_v38, 0 }
 0x139   : > { %679 = vmatpush.bf16.msra.mxu2 %v671_v41  ;;  %692 = vmatpush.bf16.msra.mxu3 %v674_v42  ;;  %v617_v45 = vpop.permute.xlu1 %616  ;;  %v562_v31 = vpop.permute.xlu2 %561 }
 0x13a   : > { %v621_v46 = vsel %vm620_vm4, %v617_v45, %v619_v24  ;;  %v622_v47 = vsel %vm620_vm4, %v619_v24, %v617_v45  ;;  %v630_v48 = vpop.permute.xlu0 %629 }
 0x13b   : > { %v625_v49 = vmul.f32 %v623_v39, %v621_v46  ;;  %v626_v50 = vmul.f32 %v624_v40, %v622_v47  ;;  %v632_v51 = vsel %vm631_vm5, %v628_v36, %v630_v48  ;;  %v633_v52 = vsel %vm631_vm5, %v630_v48, %v628_v36 }
 0x13c   : > { %v636_v53 = vmul.f32 %v634_v43, %v632_v51  ;;  %v637_v54 = vmul.f32 %v635_v44, %v633_v52  ;;  %v558_v51 = vld [vmem:[#allocation6] sm:$0xf] }
 0x13e   : > { %v655_v55 = vpack.c.bf16 %v636_v53, %v625_v49  ;;  %v656_v56 = vpack.c.bf16 %v637_v54, %v626_v50 }
 0x140   : > { %680 = vmatpush.bf16.msra.mxu2 %v655_v55  ;;  %693 = vmatpush.bf16.msra.mxu3 %v656_v56 }
 0x141   : > { %v606_v60 = vpop.permute.xlu1 %605  ;;  %v663_v52 = vpop.permute.xlu2 %662 }
 0x142   : > { %v610_v61 = vsel %vm609_vm6, %v606_v60, %v608_v59  ;;  %v611_v62 = vsel %vm609_vm6, %v608_v59, %v606_v60  ;;  %v584_v63 = vpop.permute.xlu0 %583 }
 0x143   : > { %v614_v1 = vmul.f32 %v612_v57, %v610_v61  ;;  %v615_v2 = vmul.f32 %v613_v58, %v611_v62 }
 0x145   : > { %v653_v3 = vpack.c.bf16 %v614_v1, %v1430_v21  ;;  %v654_v4 = vpack.c.bf16 %v615_v2, %v1432_v22 }
 0x147   : > { %681 = vmatpush.bf16.msra.mxu2 %v653_v3  ;;  %694 = vmatpush.bf16.msra.mxu3 %v654_v4 }
 0x149   : > { %v586_v9 = vpop.permute.xlu1 %585 }
 0x14a   : > { %v588_v11 = vsel %vm587_vm7, %v584_v63, %v586_v9  ;;  %v589_v12 = vsel %vm587_vm7, %v586_v9, %v584_v63  ;;  %v597_v13 = vpop.permute.xlu0 %596  ;;  %v499_v63 = vld [vmem:[%s1732_s5 + $0x8] sm:$0xff] }
 0x14b   : > { %v592_v14 = vmul.f32 %v590_v5, %v589_v12  ;;  %v593_v15 = vmul.f32 %v591_v6, %v588_v11  ;;  %v599_v16 = vsel %vm598_vm8, %v595_v10, %v597_v13  ;;  %v600_v17 = vsel %vm598_vm8, %v597_v13, %v595_v10 }
 0x14c   : > { %v603_v18 = vmul.f32 %v601_v7, %v600_v17  ;;  %v604_v19 = vmul.f32 %v602_v8, %v599_v16 }
 0x14e   : > { %v651_v20 = vpack.c.bf16 %v603_v18, %v592_v14  ;;  %v652_v23 = vpack.c.bf16 %v604_v19, %v593_v15 }
 0x150   : > { %682 = vmatpush.bf16.msra.mxu2 %v651_v20  ;;  %695 = vmatpush.bf16.msra.mxu3 %v652_v23 }
 0x151   : > { %v560_v24 = vpop.permute.xlu1 %559 }
 0x152   : > { %v566_v35 = vsel %vm565_vm9, %v560_v24, %v562_v31  ;;  %v567_v36 = vsel %vm565_vm9, %v562_v31, %v560_v24  ;;  %v573_v37 = vpop.permute.xlu0 %572 }
 0x153   : > { %v570_v45 = vmul.f32 %v568_v30, %v567_v36  ;;  %v571_v46 = vmul.f32 %v569_v32, %v566_v35 }
 0x159   : > { %v575_v38 = vpop.permute.xlu1 %574 }
 0x15a   : > { %v577_v41 = vsel %vm576_vm10, %v573_v37, %v575_v38  ;;  %v578_v42 = vsel %vm576_vm10, %v575_v38, %v573_v37 }
 0x15b   : > { %v581_v47 = vmul.f32 %v579_v33, %v578_v42  ;;  %v582_v48 = vmul.f32 %v580_v34, %v577_v41 }
 0x15d   : > { %v649_v49 = vpack.c.bf16 %v581_v47, %v570_v45  ;;  %v650_v50 = vpack.c.bf16 %v582_v48, %v571_v46 }
 0x15f   : > { %683 = vmatpush.bf16.msra.mxu2 %v649_v49  ;;  %696 = vmatpush.bf16.msra.mxu3 %v650_v50 }
 0x162   : > { %1011 = vmatmul.msk.bf16.vlgmr.msra.gmra.mxu2 %vm665_vm11, %v558_v51  ;;  %1012 = vmatmul.msk.bf16.vlgmr.msra.gmra.mxu3 %vm665_vm11, %v558_v51 }
 0x1e5   : > { %v685_v53 = vpop.f32.mrf.mxu2  ;;  %v698_v54 = vpop.f32.mrf.mxu3 }
 0x1e6   : > { %v686_v55 = vadd.f32 %v685_v53, %v663_v52  ;;  %v699_v56 = vadd.f32 %v698_v54, %v663_v52 }
 0x1e8   : > { %v1575_v59 = vmax.f32 %v686_v55, 0.0  ;;  %v1577_v60 = vmax.f32 %v699_v56, 0.0 }
 0x1ea   : > { %745 = vrot.lane.b32.xlu2 %v1575_v59, %s1263_s0  ;;  %761 = vrot.lane.b32.xlu0 %v1575_v59, %s1264_s23 }
 0x1eb   : > { %763 = vrot.lane.b32.xlu1 %v1577_v60, %s1264_s23  ;;  %s465_s23 = scalar_lea.vmem [#allocation9], %s999_s16  ;;  %s1203_s16 = scalar_lea.hbm %s1739_s12, 32 }
 0x1ed   : > { %v687_v61 = vpop.f32.mrf.mxu2  ;;  %v700_v62 = vpop.f32.mrf.mxu3 }
 0x1f2   : > { %755 = vrot.lane.b32.xlu2 %v1577_v60, %s1265_s30  ;;  %747 = vrot.lane.b32.xlu0 %v1577_v60, %s1263_s0  ;;  %s879_s0 = scalar_lea.hbm %s1739_s12, %s1025_s17 }
 0x1f3   : > { %753 = vrot.lane.b32.xlu1 %v1575_v59, %s1265_s30  ;;  %s881_s30 = sshll.u32 %s465_s23, 4  ;;  %s882_s30 = int_to_ptr.vmem [resolvable:$true] %s881_s30 }
 0x1fa   : > { %721 = vrot.lane.b32.xlu2 %v1575_v59, %s1267_s18  ;;  %737 = vrot.lane.b32.xlu0 %v1575_v59, %s1266_s15 }
 0x1fb   : > { %739 = vrot.lane.b32.xlu1 %v1577_v60, %s1266_s15  ;;  %s883_s15 = sshll.u32 %s879_s0, 4  ;;  %s884_s15 = int_to_ptr.hbm [resolvable:$true] %s883_s15 }
 0x202   : > { %731 = vrot.lane.b32.xlu2 %v1577_v60, %s1268_s19  ;;  %723 = vrot.lane.b32.xlu0 %v1577_v60, %s1267_s18  ;;  %s1197_s18 = sshra.s32 %s884_s15, 4  ;;  %s1198_s18 = int_to_ptr.hbm [resolvable:$true] %s1197_s18 }
 0x203   : > { %729 = vrot.lane.b32.xlu1 %v1575_v59, %s1268_s19  ;;  %s1199_s19 = scalar_lea.hbm %s1198_s18, 16  ;;  %p1204_p3 = scmp.lt.s32.totalorder %s1198_s18, %s1739_s12 }
 0x204   : > { %p1200_p0 = scmp.ne.s32.totalorder %s1198_s18, %s1199_s19  ;;  %p1205_p4 = scmp.lt.s32.totalorder %s1203_s16, %s1199_s19 }
 0x206   : > { %p1201_p1 = pnand %p1200_p0, %p1374_p5  ;;  %p1206_p7 = por %p1205_p4, %p1204_p3 }
 0x208   : > { %p1202_p2 = pneg %p1201_p1 }
 0x20a   : > { %713 = vrot.lane.b32.xlu2 %v1575_v59, %s1270_s26  ;;  %705 = vrot.lane.b32.xlu0 %v1575_v59, %s1269_s20  ;;  %p1207_p8 = pnand %p1206_p7, %p1202_p2 }
 0x20b   : > { %707 = vrot.lane.b32.xlu1 %v1577_v60, %s1269_s20 }
 0x212   : > { %507 = vperm.xlu2 %1106, %v499_v63   ;;  %715 = vrot.lane.b32.xlu0 %v1577_v60, %s1270_s26 }
 0x21a   : > { %830 = vperm.xlu0 %1105, %v827_v0  }
 0x244   : > { %v746_v1 = vpop.permute.xlu2 %745 }
 0x24c   : > { %v756_v12 = vpop.permute.xlu2 %755 }
 0x254   : > { %v722_v38 = vpop.permute.xlu2 %721 }
 0x25c   : > { %v762_v2 = vpop.permute.xlu0 %761  ;;  %v732_v49 = vpop.permute.xlu2 %731 }
 0x25d   : > { %v764_v3 = vpop.permute.xlu1 %763 }
 0x25e   : > { %v765_v4 = vsel %vm642_vm2, %v762_v2, %v764_v3  ;;  %v766_v9 = vsel %vm642_vm2, %v764_v3, %v762_v2 }
 0x25f   : > { %v767_v10 = vmul.f32 %v765_v4, %v645_v28  ;;  %v768_v11 = vmul.f32 %v766_v9, %v646_v29 }
 0x261   : > { %v777_v13 = vpack.c.bf16 %v767_v10, %v767_v10  ;;  %v778_v14 = vpack.c.bf16 %v768_v11, %v768_v11 }
 0x263   : > { %v789_v15 = vsel %vm669_vm3, %v777_v13, 0  ;;  %v792_v16 = vsel %vm669_vm3, %v778_v14, 0 }
 0x264   : > { %797 = vmatpush.bf16.msrb.mxu0 %v789_v15  ;;  %810 = vmatpush.bf16.msrb.mxu1 %v792_v16  ;;  %v748_v17 = vpop.permute.xlu0 %747  ;;  %v714_v63 = vpop.permute.xlu2 %713 }
 0x265   : > { %v749_v18 = vsel %vm620_vm4, %v746_v1, %v748_v17  ;;  %v750_v19 = vsel %vm620_vm4, %v748_v17, %v746_v1  ;;  %v754_v28 = vpop.permute.xlu1 %753 }
 0x266   : > { %v751_v29 = vmul.f32 %v749_v18, %v623_v39  ;;  %v752_v20 = vmul.f32 %v750_v19, %v624_v40  ;;  %v757_v23 = vsel %vm631_vm5, %v754_v28, %v756_v12  ;;  %v758_v24 = vsel %vm631_vm5, %v756_v12, %v754_v28  ;;  %v779_v40 = vld [vmem:[%s1736_s9] sm:$0xff] }
 0x267   : > { %v759_v31 = vmul.f32 %v757_v23, %v634_v43  ;;  %v760_v35 = vmul.f32 %v758_v24, %v635_v44  ;;  %782 = vperm.xlu1 %1107, %v779_v40  }
 0x269   : > { %v775_v36 = vpack.c.bf16 %v759_v31, %v751_v29  ;;  %v776_v37 = vpack.c.bf16 %v760_v35, %v752_v20  ;;  %v826_v31 = vld [vmem:[#allocation7] sm:$0xf] }
 0x26b   : > { %798 = vmatpush.bf16.msrb.mxu0 %v775_v36  ;;  %811 = vmatpush.bf16.msrb.mxu1 %v776_v37 }
 0x26c   : > { %v738_v39 = vpop.permute.xlu0 %737  ;;  %v508_v11 = vpop.permute.xlu2 %507 }
 0x26d   : > { %v740_v41 = vpop.permute.xlu1 %739 }
 0x26e   : > { %v741_v42 = vsel %vm609_vm6, %v738_v39, %v740_v41  ;;  %v742_v43 = vsel %vm609_vm6, %v740_v41, %v738_v39 }
 0x26f   : > { %v743_v44 = vmul.f32 %v741_v42, %v612_v57  ;;  %v744_v45 = vmul.f32 %v742_v43, %v613_v58 }
 0x271   : > { %v773_v46 = vpack.c.bf16 %v743_v44, %v1575_v59  ;;  %v774_v47 = vpack.c.bf16 %v744_v45, %v1577_v60 }
 0x273   : > { %799 = vmatpush.bf16.msrb.mxu0 %v773_v46  ;;  %812 = vmatpush.bf16.msrb.mxu1 %v774_v47 }
 0x274   : > { %v724_v48 = vpop.permute.xlu0 %723 }
 0x275   : > { %v725_v50 = vsel %vm587_vm7, %v722_v38, %v724_v48  ;;  %v726_v51 = vsel %vm587_vm7, %v724_v48, %v722_v38  ;;  %v730_v52 = vpop.permute.xlu1 %729 }
 0x276   : > { %v727_v57 = vmul.f32 %v726_v51, %v590_v5  ;;  %v728_v58 = vmul.f32 %v725_v50, %v591_v6  ;;  %v733_v53 = vsel %vm598_vm8, %v730_v52, %v732_v49  ;;  %v734_v54 = vsel %vm598_vm8, %v732_v49, %v730_v52 }
 0x277   : > { %v735_v55 = vmul.f32 %v734_v54, %v601_v7  ;;  %v736_v56 = vmul.f32 %v733_v53, %v602_v8 }
 0x279   : > { %v771_v59 = vpack.c.bf16 %v735_v55, %v727_v57  ;;  %v772_v60 = vpack.c.bf16 %v736_v56, %v728_v58 }
 0x27b   : > { %800 = vmatpush.bf16.msrb.mxu0 %v771_v59  ;;  %813 = vmatpush.bf16.msrb.mxu1 %v772_v60 }
 0x27c   : > { %v706_v5 = vpop.permute.xlu0 %705 }
 0x27d   : > { %v708_v61 = vpop.permute.xlu1 %707 }
 0x27e   : > { %v709_v6 = vsel %vm565_vm9, %v706_v5, %v708_v61  ;;  %v710_v62 = vsel %vm565_vm9, %v708_v61, %v706_v5 }
 0x27f   : > { %v711_v1 = vmul.f32 %v710_v62, %v568_v30  ;;  %v712_v2 = vmul.f32 %v709_v6, %v569_v32  ;;  %v537_v30 = vpop.f32.mrf.mxu0  ;;  %v551_v32 = vpop.f32.mrf.mxu1 }
 0x280   : > { %v538_v27 = vadd.f32 %v537_v30, %v508_v11 }
 0x282   : > { %v556_v17 = vmax.f32 %v538_v27, 0.0 }
 0x284   : > { %v716_v0 = vpop.permute.xlu0 %715 }
 0x285   : > { %v717_v7 = vsel %vm576_vm10, %v714_v63, %v716_v0  ;;  %v718_v8 = vsel %vm576_vm10, %v716_v0, %v714_v63 }
 0x286   : > { %v719_v3 = vmul.f32 %v718_v8, %v579_v33  ;;  %v720_v4 = vmul.f32 %v717_v7, %v580_v34  ;;  %v552_v34 = vadd.f32 %v551_v32, %v508_v11 }
 0x288   : > { %v769_v9 = vpack.c.bf16 %v719_v3, %v711_v1  ;;  %v770_v10 = vpack.c.bf16 %v720_v4, %v712_v2  ;;  %v557_v18 = vmax.f32 %v552_v34, 0.0 }
 0x28a   : > { %801 = vmatpush.bf16.msrb.mxu0 %v769_v9  ;;  %814 = vmatpush.bf16.msrb.mxu1 %v770_v10 }
 0x28d   : > { %1013 = vmatmul.msk.bf16.vlgmr.msrb.gmra.mxu0 %vm665_vm11, %v704_v25  ;;  %1014 = vmatmul.msk.bf16.vlgmr.msrb.gmra.mxu1 %vm665_vm11, %v704_v25 }
 0x2d9   : > { %v783_v26 = vpop.permute.xlu1 %782 }
 0x30a   : > { %v803_v33 = vpop.f32.mrf.mxu0  ;;  %v816_v12 = vpop.f32.mrf.mxu1 }
 0x30b   : > { %v804_v13 = vadd.f32 %v803_v33, %v783_v26  ;;  %v817_v14 = vadd.f32 %v816_v12, %v783_v26 }
 0x30d   : > { %v820_v15 = vmax.f32 %v804_v13, 0.0  ;;  %v821_v16 = vmax.f32 %v817_v14, 0.0 }
 0x30f   : > { %v822_v19 = vadd.f32 %v820_v15, %v1430_v21  ;;  %v823_v28 = vadd.f32 %v821_v16, %v1432_v22  ;;  %v831_v21 = vpop.permute.xlu0 %830 }
 0x311   : > { %v824_v29 = vpack.c.bf16 %v556_v17, %v822_v19  ;;  %v825_v20 = vpack.c.bf16 %v557_v18, %v823_v28 }
 0x312   : > { %v805_v23 = vpop.f32.mrf.mxu0  ;;  %v818_v24 = vpop.f32.mrf.mxu1 }
 0x313   : > { %844 = vmatpush.bf16.msrb.mxu2 %v824_v29  ;;  %857 = vmatpush.bf16.msrb.mxu3 %v825_v20 }
 0x316   : > { %1015 = vmatmul.msk.bf16.vlgmr.msrb.gmra.mxu2 %vm833_vm12, %v826_v31  ;;  %1016 = vmatmul.msk.bf16.vlgmr.msrb.gmra.mxu3 %vm833_vm12, %v826_v31 }
 0x399   : > { %v846_v35 = vpop.f32.mrf.mxu2  ;;  %v859_v22 = vpop.f32.mrf.mxu3 }
 0x39a   : > { %v847_v36 = vadd.f32 %v846_v35, %v831_v21  ;;  %v860_v37 = vadd.f32 %v859_v22, %v831_v21 }
 0x39c   : > { %v863_v38 = vmax.f32 %v847_v36, 0.0  ;;  %v864_v39 = vmax.f32 %v860_v37, 0.0 }
 0x39e   : > { %865 = vst [vmem:[%s465_s23] sm:$0xff] %v863_v38 }
 0x39f   : > { %866 = vst [vmem:[%s465_s23 + $0x8] sm:$0xff] %v864_v39 }
 0x3a0   : > { %1210 = shalt.err (!%p1207_p8)
}
 0x3a1   : > { %1038 = dma.vmem_to_hbm [thread:$0]  (%p1374_p5), %s882_s30, 256, %s884_s15, %s868_s25   ;;  %v848_v41 = vpop.f32.mrf.mxu2  ;;  %v861_v40 = vpop.f32.mrf.mxu3 }
 0x3a2 PF: > { %p1060_p9 = scmp.ge.s32.totalorder %s1257_s24, 2  ;;  %s895_s29 = sand.u32 1, %s1245_s21  }
 0x3a3   : > { %s896_s28 = scalar_lea.sflag [#allocation4], %s895_s29 }
 0x3a4   : > { %p1051_p10 = pnand %p1060_p9, %p1378_p6 }
 0x3a6   : > { %p1052_p11 = pneg %p1051_p10 }
 0x3a8   : > { %1240 = dma.done.wait (%p1052_p11), %s896_s28, 256  }
 0x3a9   : > { %1242 = vsyncadd (%p1052_p11), %s896_s28, 4294967040  ;;  %s1751_s24 = sld [smem:[#allocation15_spill]]  ;;  %s1754_s21 = smov %s1249_s22 }
 0x3aa   : > { %s1752_s0 = sld [smem:[#allocation14_spill]] }
 0x3ab   : > { %s1753_s23 = sld [smem:[#allocation16_spill]] }
 0x3af   : > { %p25_p5 = scmp.ge.s32.totalorder %s1751_s24, 4  }
 0x3b0   : > { %s1755_s22 = smov %s1752_s0 }
 0x3b1   :  { %27 = sbr.rel (!%p25_p5) target bundleno = 8 (0x8), region = 120 }
 0x3b6   :  { %902 = vsyncpa [#allocation3], 1 }
 0x3b7   :  { %904 = vsyncpa [#allocation3 + $0x1], 1 }
 0x3b8   :  { %905 = vsyncpa [#allocation8], 1 }
 0x3b9   :  { %906 = vsyncpa [#allocation4], 1 }
 0x3ba   :  { %908 = vsyncpa [#allocation4 + $0x1], 1 }
 0x3bb   :  { %909 = vsyncpa [#allocation5], 1 }
 0x3bc   :  { %911 = vsyncpa [#allocation5 + $0x1], 1 }

</bundles_post_ra>
